<compile_context>
chip_gen: v7x
topology: tpu7x:2x2x1
jax: 0.10.0
libtpu: 0.0.40
codegen_flags: <defaults>
</compile_context>

<pallas_src>
import functools

import jax
import jax.numpy as jnp
from jax.experimental import pallas as pl
from jax.experimental.pallas import tpu as pltpu


def _patch_expand_kernel(x_ref, w_ref, savg_ref, sbc_ref, sbcg_ref, beta_ref,
                         o_ref, *, eps):
    # x_ref: (tm, dim)          w_ref: (dim, 4*dim)
    # savg_ref: (4*dim, 8)      sbc_ref / sbcg_ref: (8, 4*dim)
    # beta_ref: (1, 4*dim)      o_ref: (tm, 4*dim)
    y = jnp.dot(x_ref[...], w_ref[...], preferred_element_type=jnp.float32)

    # Grouped LayerNorm stats on the MXU (all math in f32, centred variance).
    savg = savg_ref[...]
    means = jnp.dot(y, savg, preferred_element_type=jnp.float32)           # (tm, 8)
    mean_full = jnp.dot(means, sbc_ref[...],
                        preferred_element_type=jnp.float32)                # (tm, 4*dim)
    yc = y - mean_full
    var = jnp.dot(yc * yc, savg, preferred_element_type=jnp.float32)       # (tm, 8)
    inv = jax.lax.rsqrt(var + eps)
    # gamma is pre-folded into sbcg: scale = broadcast(inv) * gamma_tiled.
    scale = jnp.dot(inv, sbcg_ref[...], preferred_element_type=jnp.float32)
    o_ref[...] = (yc * scale + beta_ref[...]).astype(o_ref.dtype)   # one lane-dense store


def _round_up(x, m):
    return -(-x // m) * m


def _cdiv(a, b):
    return -(-a // b)


def _sublane_multiple(dtype):
    # (8,128) tiles for 4-byte dtypes, (16,128) for bf16, (32,128) for 8-bit.
    return max(8, 32 // jnp.dtype(dtype).itemsize)


def _vmem_capacity_bytes():
    try:
        return int(pltpu.get_tpu_info().vmem_capacity_bytes)
    except Exception:
        return 64 * 2**20   # conservative default (v7x per-TensorCore VMEM)


def _choose_row_tile(n_rows, gran, per_row_bytes, fixed_bytes, vmem_budget, tm_req):
    """Largest row tile fitting the VMEM budget, with >=2 (pref >=8) grid steps."""
    if tm_req is not None:
        return _round_up(tm_req, gran), _round_up(n_rows, _round_up(tm_req, gran))
    budget = max(gran * per_row_bytes, vmem_budget - fixed_bytes)
    tm = 1024
    while tm > gran and tm * per_row_bytes > budget:
        tm //= 2
    # Prefer >=8 grid steps while tiles stay large (>=256 rows) ...
    while tm > max(gran, 256) and _cdiv(n_rows, tm) < 8:
        tm //= 2
    # ... and always guarantee >=2 steps when the problem allows it
    # (hides the dominant output writeback, keeps both v7x TensorCores busy).
    while tm > gran and _cdiv(n_rows, tm) < 2:
        tm //= 2
    tm = max(tm, gran)
    return tm, _round_up(n_rows, tm)


def patch_expand_3d(x, w, gamma, beta, input_resolution, *, eps=1e-5, tm=None,
                    mxu_dtype="auto", out_dtype=None):
    """Pallas implementation of PatchExpand3D(dim_scale=2) forward.

    x     : (B, L, dim)   with L = Z*H*W
    w     : (dim, 4*dim)  == torch Linear weight (4*dim, dim) transposed
    gamma : (dim//2,)     LayerNorm weight
    beta  : (dim//2,)     LayerNorm bias
    mxu_dtype: dtype used to feed the MXU ("auto" -> bf16 for f32 inputs);
               accumulation and all LayerNorm math stay f32.
    out_dtype: kernel/output dtype (default x.dtype); bf16 halves the dominant
               store + epilogue HBM traffic of this mem-bound op.
    returns (B, 8*L, dim//2)
    """
    Z, H, W = input_resolution
    B, L, dim = x.shape
    assert L == Z * H * W, f"input feature has wrong size {L} != {Z}*{H}*{W}"
    assert w.shape == (dim, 4 * dim), w.shape
    assert dim % 2 == 0
    c4 = 4 * dim
    cg = dim // 2
    out_dtype = jnp.dtype(out_dtype) if out_dtype is not None else x.dtype

    if isinstance(mxu_dtype, str) and mxu_dtype == "auto":
        mxu_dtype = jnp.bfloat16 if x.dtype == jnp.float32 else x.dtype
    if mxu_dtype is not None:
        x = x.astype(mxu_dtype)
        w = w.astype(mxu_dtype)

    N = B * L
    x2d = x.reshape(N, dim)

    in_b = x2d.dtype.itemsize
    w_b = w.dtype.itemsize
    out_b = jnp.dtype(out_dtype).itemsize

    # Row-tile granularity: packed dtypes need (16,128)/(32,128) sublane tiles.
    gran = max(_sublane_multiple(x2d.dtype), _sublane_multiple(out_dtype))

    # Per-row VMEM: double-buffered x & out tiles + ~4 live (tm, c4) f32 temps.
    per_row = 2 * dim * in_b + 2 * c4 * out_b + 4 * c4 * 4
    # Grid-invariant operands are single-buffered (pl.Buffered(1)).
    fixed = dim * c4 * w_b + (c4 * 8 + 2 * 8 * c4 + c4) * 4
    vmem_budget = int(0.82 * _vmem_capacity_bytes())   # ~52 MiB v7x, ~105 MiB v5e/v6e

    tm, n_pad = _choose_row_tile(N, gran, per_row, fixed, vmem_budget, tm)
    if n_pad != N:
        x2d = jnp.pad(x2d, ((0, n_pad - N), (0, 0)))

    f32 = jnp.float32
    eye8 = jnp.eye(8, dtype=f32)
    savg = jnp.repeat(eye8, cg, axis=0) / cg            # (4*dim, 8) group averaging
    sbc = jnp.repeat(eye8, cg, axis=1)                  # (8, 4*dim) group broadcast
    g_t = jnp.tile(gamma.astype(f32), 8).reshape(1, c4)
    sbcg = sbc * g_t                                    # gamma folded into broadcast
    beta_t = jnp.tile(beta.astype(f32), 8).reshape(1, c4)

    grid = (n_pad // tm,)
    kernel = functools.partial(_patch_expand_kernel, eps=eps)

    def inv_spec(shape):
        return pl.BlockSpec(shape, lambda i: (0,) * len(shape),
                            pipeline_mode=pl.Buffered(1))

    cost = pl.CostEstimate(
        flops=int(2 * n_pad * dim * c4          # main GEMM
                  + 4 * 2 * n_pad * 8 * c4      # stats + broadcast matmuls
                  + 4 * n_pad * c4),            # elementwise epilogue
        transcendentals=int(n_pad * 8),
        bytes_accessed=int(N * dim * in_b + dim * c4 * w_b + N * c4 * out_b),
    )

    y2d = pl.pallas_call(
        kernel,
        out_shape=jax.ShapeDtypeStruct((n_pad, c4), out_dtype),
        grid_spec=pltpu.PrefetchScalarGridSpec(
            num_scalar_prefetch=0,
            grid=grid,
            in_specs=[
                pl.BlockSpec((tm, dim), lambda i: (i, 0)),
                inv_spec((dim, c4)),
                inv_spec((c4, 8)),
                inv_spec((8, c4)),
                inv_spec((8, c4)),
                inv_spec((1, c4)),
            ],
            out_specs=pl.BlockSpec((tm, c4), lambda i: (i, 0)),
        ),
        compiler_params=pltpu.CompilerParams(
            dimension_semantics=("parallel",),
            vmem_limit_bytes=vmem_budget,
        ),
        cost_estimate=cost,
    )(x2d, w, savg, sbc, sbcg, beta_t)

    if n_pad != N:
        y2d = y2d[:N]

    # Glue: 'b z h w (p1 p2 p3 c) -> b (z p1) (h p2) (w p3) c', p1=p2=p3=2.
    # TODO(synk): fuse this scatter into the kernel output (needs strided
    # multi-dim sub-stores / 6-D vreg transpose; Mosaic lowering not guaranteed).
    y = y2d.reshape(B, Z, H, W, 2, 2, 2, cg)
    y = jnp.transpose(y, (0, 1, 4, 2, 5, 3, 6, 7))
    return y.reshape(B, 8 * L, cg)


def _reference(x, w, gamma, beta, input_resolution, eps=1e-5):
    """Pure-JAX reference matching the PyTorch forward."""
    Z, H, W = input_resolution
    B, L, dim = x.shape
    y = jnp.einsum("blc,cd->bld", x, w)            # Linear, no bias
    cg = dim // 2
    y = y.reshape(B, Z, H, W, 2, 2, 2, cg)
    y = jnp.transpose(y, (0, 1, 4, 2, 5, 3, 6, 7)).reshape(B, -1, cg)
    mean = jnp.mean(y, axis=-1, keepdims=True)
    var = jnp.mean((y - mean) ** 2, axis=-1, keepdims=True)
    return (y - mean) * jax.lax.rsqrt(var + eps) * gamma + beta


if __name__ == "__main__":
    # Small shapes consistent with the module: input_resolution=(Z,H,W)=(2,4,4),
    # dim=32  ->  x: (B, Z*H*W, dim) = (2, 32, 32)
    B = 2
    Z, H, W = 2, 4, 4
    dim = 32

    key = jax.random.PRNGKey(0)
    kx, kw, kg, kb = jax.random.split(key, 4)
    x = jax.random.normal(kx, (B, Z * H * W, dim), dtype=jnp.float32)
    # Linear(dim, 4*dim, bias=False): torch weight is (4*dim, dim); store transposed.
    w = jax.random.normal(kw, (dim, 4 * dim), dtype=jnp.float32) * 0.05
    gamma = 1.0 + 0.1 * jax.random.normal(kg, (dim // 2,), dtype=jnp.float32)
    beta = 0.1 * jax.random.normal(kb, (dim // 2,), dtype=jnp.float32)

    # Exact f32 MXU path vs exact reference.
    out_f32 = patch_expand_3d(x, w, gamma, beta, (Z, H, W), mxu_dtype=jnp.float32)
    out_f32 = jax.block_until_ready(out_f32)
    ref = _reference(x, w, gamma, beta, (Z, H, W))
    assert out_f32.shape == (B, 8 * Z * H * W, dim // 2), out_f32.shape
    assert jnp.allclose(out_f32, ref, atol=5e-4, rtol=5e-4), "f32 mismatch vs reference"

    # Default path: bf16 MXU feed (f32 accumulation / LayerNorm), f32 output.
    out_bf = patch_expand_3d(x, w, gamma, beta, (Z, H, W))
    out_bf = jax.block_until_ready(out_bf)
    x_b = x.astype(jnp.bfloat16).astype(jnp.float32)
    w_b = w.astype(jnp.bfloat16).astype(jnp.float32)
    ref_bf = _reference(x_b, w_b, gamma, beta, (Z, H, W))
    assert jnp.allclose(out_bf, ref_bf, atol=2e-3, rtol=2e-3), "bf16-feed mismatch"

    # bf16 output path (recommended when the consumer accepts bf16).
    out_lo = patch_expand_3d(x, w, gamma, beta, (Z, H, W), out_dtype=jnp.bfloat16)
    out_lo = jax.block_until_ready(out_lo)
    assert out_lo.dtype == jnp.bfloat16
    assert jnp.allclose(out_lo.astype(jnp.float32), ref_bf, atol=3e-2, rtol=3e-2), \
        "bf16-out mismatch"

    print("KERNEL_OK")
</pallas_src>

<mosaic_0001>
module attributes {stable_mosaic.version = 11 : i64} {
  func.func @_patch_expand_kernel(%arg0: i32, %arg1: memref<32x32xf32, #tpu.memory_space<vmem>>, %arg2: memref<32x128xf32, #tpu.memory_space<vmem>>, %arg3: memref<128x8xf32, #tpu.memory_space<vmem>>, %arg4: memref<8x128xf32, #tpu.memory_space<vmem>>, %arg5: memref<8x128xf32, #tpu.memory_space<vmem>>, %arg6: memref<1x128xf32, #tpu.memory_space<vmem>>, %arg7: memref<32x128xf32, #tpu.memory_space<vmem>>) attributes {dimension_semantics = [#tpu.dimension_semantics<parallel>], iteration_bounds = array<i64: 2>, scalar_prefetch = 0 : i64, scratch_operands = 0 : i64, tpu.core_type = #tpu.core_type<tc>, window_params = [{transform_indices = @transform_0, window_bounds = array<i64: 32, 32>}, {pipeline_mode = #tpu.pipeline_mode<synchronous>, transform_indices = @transform_1, window_bounds = array<i64: 32, 128>}, {pipeline_mode = #tpu.pipeline_mode<synchronous>, transform_indices = @transform_2, window_bounds = array<i64: 128, 8>}, {pipeline_mode = #tpu.pipeline_mode<synchronous>, transform_indices = @transform_3, window_bounds = array<i64: 8, 128>}, {pipeline_mode = #tpu.pipeline_mode<synchronous>, transform_indices = @transform_4, window_bounds = array<i64: 8, 128>}, {pipeline_mode = #tpu.pipeline_mode<synchronous>, transform_indices = @transform_5, window_bounds = array<i64: 1, 128>}, {transform_indices = @transform_6, window_bounds = array<i64: 32, 128>}]} {
    %c0 = arith.constant 0 : index
    %c0_0 = arith.constant 0 : index
    %0 = vector.load %arg1[%c0, %c0_0] : memref<32x32xf32, #tpu.memory_space<vmem>>, vector<32x32xf32>
    %c0_1 = arith.constant 0 : index
    %c0_2 = arith.constant 0 : index
    %1 = vector.load %arg2[%c0_1, %c0_2] : memref<32x128xf32, #tpu.memory_space<vmem>>, vector<32x128xf32>
    %cst = arith.constant dense<0.000000e+00> : vector<32x128xf32>
    %2 = tpu.matmul %0, %1, %cst {dimension_numbers = #tpu.dot_dimension_numbers<[1], [0], [0], [1], [0, 0, 1, 1], [], []>} : vector<32x32xf32>, vector<32x128xf32>, vector<32x128xf32> -> vector<32x128xf32>
    %c0_3 = arith.constant 0 : index
    %c0_4 = arith.constant 0 : index
    %3 = vector.load %arg3[%c0_3, %c0_4] : memref<128x8xf32, #tpu.memory_space<vmem>>, vector<128x8xf32>
    %cst_5 = arith.constant dense<0.000000e+00> : vector<32x8xf32>
    %4 = tpu.matmul %2, %3, %cst_5 {dimension_numbers = #tpu.dot_dimension_numbers<[1], [0], [0], [1], [0, 0, 1, 1], [], []>} : vector<32x128xf32>, vector<128x8xf32>, vector<32x8xf32> -> vector<32x8xf32>
    %c0_6 = arith.constant 0 : index
    %c0_7 = arith.constant 0 : index
    %5 = vector.load %arg4[%c0_6, %c0_7] : memref<8x128xf32, #tpu.memory_space<vmem>>, vector<8x128xf32>
    %cst_8 = arith.constant dense<0.000000e+00> : vector<32x128xf32>
    %6 = tpu.matmul %4, %5, %cst_8 {dimension_numbers = #tpu.dot_dimension_numbers<[1], [0], [0], [1], [0, 0, 1, 1], [], []>} : vector<32x8xf32>, vector<8x128xf32>, vector<32x128xf32> -> vector<32x128xf32>
    %7 = arith.subf %2, %6 : vector<32x128xf32>
    %8 = arith.mulf %7, %7 : vector<32x128xf32>
    %cst_9 = arith.constant dense<0.000000e+00> : vector<32x8xf32>
    %9 = tpu.matmul %8, %3, %cst_9 {dimension_numbers = #tpu.dot_dimension_numbers<[1], [0], [0], [1], [0, 0, 1, 1], [], []>} : vector<32x128xf32>, vector<128x8xf32>, vector<32x8xf32> -> vector<32x8xf32>
    %cst_10 = arith.constant 9.99999974E-6 : f32
    %10 = vector.broadcast %cst_10 : f32 to vector<32x8xf32>
    %11 = arith.addf %9, %10 : vector<32x8xf32>
    %12 = math.rsqrt %11 : vector<32x8xf32>
    %c0_11 = arith.constant 0 : index
    %c0_12 = arith.constant 0 : index
    %13 = vector.load %arg5[%c0_11, %c0_12] : memref<8x128xf32, #tpu.memory_space<vmem>>, vector<8x128xf32>
    %cst_13 = arith.constant dense<0.000000e+00> : vector<32x128xf32>
    %14 = tpu.matmul %12, %13, %cst_13 {dimension_numbers = #tpu.dot_dimension_numbers<[1], [0], [0], [1], [0, 0, 1, 1], [], []>} : vector<32x8xf32>, vector<8x128xf32>, vector<32x128xf32> -> vector<32x128xf32>
    %15 = arith.mulf %7, %14 : vector<32x128xf32>
    %c0_14 = arith.constant 0 : index
    %c0_15 = arith.constant 0 : index
    %16 = vector.load %arg6[%c0_14, %c0_15] : memref<1x128xf32, #tpu.memory_space<vmem>>, vector<1x128xf32>
    %17 = vector.broadcast %16 : vector<1x128xf32> to vector<32x128xf32>
    %18 = arith.addf %15, %17 : vector<32x128xf32>
    %c0_16 = arith.constant 0 : index
    %c0_17 = arith.constant 0 : index
    %19 = vector.load %arg7[%c0_16, %c0_17] : memref<32x128xf32, #tpu.memory_space<vmem>>, vector<32x128xf32>
    tpu.vector_store %arg7[%c0_16, %c0_17], %18 {strides = array<i32>} : memref<32x128xf32, #tpu.memory_space<vmem>>, vector<32x128xf32>,
    return
  }
  func.func @transform_0(%arg0: i32) -> (i32, i32) {
    %c0_i32 = arith.constant 0 : i32
    %c0_i32_0 = arith.constant 0 : i32
    return %arg0, %c0_i32 : i32, i32
  }
  func.func @transform_1(%arg0: i32) -> (i32, i32) {
    %c0_i32 = arith.constant 0 : i32
    %c0_i32_0 = arith.constant 0 : i32
    %c0_i32_1 = arith.constant 0 : i32
    return %c0_i32, %c0_i32_0 : i32, i32
  }
  func.func @transform_2(%arg0: i32) -> (i32, i32) {
    %c0_i32 = arith.constant 0 : i32
    %c0_i32_0 = arith.constant 0 : i32
    %c0_i32_1 = arith.constant 0 : i32
    return %c0_i32, %c0_i32_0 : i32, i32
  }
  func.func @transform_3(%arg0: i32) -> (i32, i32) {
    %c0_i32 = arith.constant 0 : i32
    %c0_i32_0 = arith.constant 0 : i32
    %c0_i32_1 = arith.constant 0 : i32
    return %c0_i32, %c0_i32_0 : i32, i32
  }
  func.func @transform_4(%arg0: i32) -> (i32, i32) {
    %c0_i32 = arith.constant 0 : i32
    %c0_i32_0 = arith.constant 0 : i32
    %c0_i32_1 = arith.constant 0 : i32
    return %c0_i32, %c0_i32_0 : i32, i32
  }
  func.func @transform_5(%arg0: i32) -> (i32, i32) {
    %c0_i32 = arith.constant 0 : i32
    %c0_i32_0 = arith.constant 0 : i32
    %c0_i32_1 = arith.constant 0 : i32
    return %c0_i32, %c0_i32_0 : i32, i32
  }
  func.func @transform_6(%arg0: i32) -> (i32, i32) {
    %c0_i32 = arith.constant 0 : i32
    %c0_i32_0 = arith.constant 0 : i32
    return %arg0, %c0_i32 : i32, i32
  }
}

</mosaic_0001>

<bundles_post_ra>
// kernel: tpu_custom_call.1
= control target key start
LH: loop header
LB: loop body
LE: loop exit
PB: predicated region body
PF: predicated region fallthrough
CT: control target
= control target key end

     0   :  { %11 = vsyncpa [#allocation3], 0  ;;  %s1457_s0 = inlined_call_operand.vmem [shape: f32[64,32], index: 0, kind: input, shape index: {}]   ;;  %s1458_s1 = inlined_call_operand.vmem [shape: f32[32,128], index: 1, kind: input, shape index: {}]   ;;  %s1459_s2 = inlined_call_operand.vmem [shape: f32[128,8], index: 2, kind: input, shape index: {}]   ;;  %s1460_s3 = inlined_call_operand.vmem [shape: f32[8,128], index: 3, kind: input, shape index: {}]   ;;  %s1461_s4 = inlined_call_operand.vmem [shape: f32[8,128], index: 4, kind: input, shape index: {}]   ;;  %s1462_s5 = inlined_call_operand.vmem [shape: f32[1,128], index: 5, kind: input, shape index: {}]   ;;  %s1463_s6 = inlined_call_operand.hbm [shape: f32[64,128], index: 6, kind: output, shape index: {}]  }
   0x1   :  { %13 = vsyncpa [#allocation3 + $0x1], 0  ;;  %s1262_s21 = smov 0   ;;  %s1264_s22 = smov 0  }
   0x2   :  { %s1266_s23 = smov 0   ;;  %s1268_s24 = smov 0  }
   0x3 LB: > { %s1283_s25 = sadd.s32 4294967295, %s1222_s24   ;;  %s849_s26 = sadd.s32 4294967294, %s1222_s24   ;;  %s1222_s24 = sphi %s1268_s24, %s1469_s24   ;;  %s1218_s23 = sphi %s1266_s23, %s1468_s23   ;;  %s1214_s22 = sphi %s1264_s22, %s1467_s22   ;;  %s1210_s21 = sphi %s1262_s21, %s1466_s21  }
   0x4   : > { %s1287_s27 = sadd.s32 1, %s1222_s24   ;;  %s157_s28 = sadd.s32 1, %s1218_s23 }
   0x5   : > { %s154_s29 = ssub.s32 %s1222_s24, %s1287_s27  ;;  %p167_p0 = scmp.ne.s32.totalorder %s1218_s23, %s1214_s22 }
   0x6   : > { %p155_p1 = scmp.eq.s32.totalorder %s154_s29, 0  ;;  %p168_p2 = scmp.eq.s32.totalorder %s1283_s25, 1 }
   0x7   : > { %p173_p3 = scmp.ne.s32.totalorder %s1214_s22, %s1210_s21  ;;  %p174_p4 = scmp.eq.s32.totalorder %s849_s26, 1 }
   0x8   : > { %s1298_s30 = scalar_select %p155_p1, %s1218_s23, %s157_s28  }
   0x9   : > { %p1300_p5 = por %p168_p2, %p167_p0  ;;  %p1304_p6 = por %p174_p4, %p173_p3 }
   0xa   : > { %p852_p7 = scmp.ge.s32.totalorder %s1222_s24, 1  ;;  %p216_p8 = scmp.lt.s32.totalorder %s1222_s24, 3 }
   0xc   : > { %p217_p9 = pnand %p852_p7, %p216_p8 }
   0xd   : > { %v257_v0 = vld [vmem:[%s1458_s1] sm:$0xff] (!%p217_p9)  ;;  %v258_v1 = vld [vmem:[%s1458_s1 + $0x8] sm:$0xff] (!%p217_p9)  ;;  %v259_v2 = vld [vmem:[%s1458_s1 + $0x10] sm:$0xff] (!%p217_p9)  ;;  %s854_s15 = sshll.u32 (!%p217_p9), %s1283_s25, 2  ;;  %vm261_vm0 = vcmask (!%p217_p9), 261120   ;;  %vm461_vm1 = vcmask (!%p217_p9), 64512  }
   0xe   : > { %220 = sbr.rel (%p217_p9) target bundleno = 1135 (0x46f), region = 44  ;;  %v1039_v3 = vpack.c.bf16 (!%p217_p9), %v258_v1, %v257_v0  ;;  %v260_v4 = vld [vmem:[%s1458_s1 + $0x18] sm:$0xff] (!%p217_p9)  ;;  %p247_p10 = scmp.lt.s32.totalorder (!%p217_p9), %s854_s15, 7  ;;  %v359_v5 = vld [vmem:[%s1459_s2] sm:$0xff] (!%p217_p9)  ;;  %v360_v6 = vld [vmem:[%s1459_s2 + $0x8] sm:$0xff] (!%p217_p9) }
   0xf   : > { %v1043_v7 = vpack.c.bf16 (!%p217_p9), %v260_v4, %v259_v2  ;;  %v1329_v8 = vpack.c.bf16 (!%p217_p9), %v360_v6, %v359_v5  ;;  %v361_v9 = vld [vmem:[%s1459_s2 + $0x10] sm:$0xff] (!%p217_p9)  ;;  %v362_v10 = vld [vmem:[%s1459_s2 + $0x18] sm:$0xff] (!%p217_p9)  ;;  %v363_v12 = vld [vmem:[%s1459_s2 + $0x20] sm:$0xff] (!%p217_p9)  ;;  %s243_s13 = sand.u32 (!%p217_p9), 1, %s1214_s22   ;;  %s874_s20 = sshll.u32 (!%p217_p9), %s1283_s25, 9 }
  0x10   : > { %1040 = vmatprep.subr.bf16.mxu0 (!%p217_p9), %v1039_v3  ;;  %v1337_v11 = vpack.c.bf16 (!%p217_p9), %v362_v10, %v361_v9  ;;  %v364_v13 = vld [vmem:[%s1459_s2 + $0x28] sm:$0xff] (!%p217_p9)  ;;  %v365_v16 = vld [vmem:[%s1459_s2 + $0x30] sm:$0xff] (!%p217_p9)  ;;  %v366_v17 = vld [vmem:[%s1459_s2 + $0x38] sm:$0xff] (!%p217_p9)  ;;  %s853_s14 = sshll.u32 (!%p217_p9), %s243_s13, 5  ;;  %s1414_s29 = scalar_lea.hbm (!%p217_p9), %s1463_s6, %s874_s20 }
  0x11   : > { %1042 = vmatpush3.bf16.msra.mxu0 (!%p217_p9), %v1039_v3  ;;  %1048 = vmatprep.subr.bf16.mxu1 (!%p217_p9), %v1329_v8  ;;  %v1055_v14 = vpack.c.bf16 (!%p217_p9), %v364_v13, %v363_v12  ;;  %v1059_v20 = vpack.c.bf16 (!%p217_p9), %v366_v17, %v365_v16  ;;  %v367_v21 = vld [vmem:[%s1459_s2 + $0x40] sm:$0xff] (!%p217_p9)  ;;  %v368_v22 = vld [vmem:[%s1459_s2 + $0x48] sm:$0xff] (!%p217_p9)  ;;  %v369_v25 = vld [vmem:[%s1459_s2 + $0x50] sm:$0xff] (!%p217_p9)  ;;  %s245_s18 = scalar_lea.vmem (!%p217_p9), [#allocation2], %s853_s14  ;;  %s1416_s25 = scalar_lea.sflag (!%p217_p9), [#allocation3], %s243_s13 }
  0x12   : > { %1044 = vmatprep.subr.bf16.mxu0 (!%p217_p9), %v1043_v7  ;;  %1050 = vmatpush3.bf16.msra.mxu1 (!%p217_p9), %v1329_v8  ;;  %v1063_v24 = vpack.c.bf16 (!%p217_p9), %v368_v22, %v367_v21  ;;  %v370_v26 = vld [vmem:[%s1459_s2 + $0x58] sm:$0xff] (!%p217_p9)  ;;  %v371_v28 = vld [vmem:[%s1459_s2 + $0x60] sm:$0xff] (!%p217_p9)  ;;  %v372_v29 = vld [vmem:[%s1459_s2 + $0x68] sm:$0xff] (!%p217_p9)  ;;  %s1224_s9 = smov (!%p217_p9), [#allocation2]  }
  0x13   : > { %1052 = vmatprep.subr.bf16.mxu1 (!%p217_p9), %v1337_v11  ;;  %v1067_v27 = vpack.c.bf16 (!%p217_p9), %v370_v26, %v369_v25  ;;  %v1071_v30 = vpack.c.bf16 (!%p217_p9), %v372_v29, %v371_v28  ;;  %v373_v31 = vld [vmem:[%s1459_s2 + $0x70] sm:$0xff] (!%p217_p9)  ;;  %v374_v32 = vld [vmem:[%s1459_s2 + $0x78] sm:$0xff] (!%p217_p9)  ;;  %v460_v34 = vld [vmem:[%s1460_s3] sm:$0xff] (!%p217_p9)  ;;  %s1164_s10 = sshll.u32 (!%p217_p9), %s1224_s9, 4  ;;  %s1165_s10 = int_to_ptr.vmem [resolvable:$false] %s1164_s10 }
  0x14   : > { %v1075_v33 = vpack.c.bf16 (!%p217_p9), %v374_v32, %v373_v31  ;;  %v656_v55 = vld [vmem:[%s1461_s4] sm:$0xff] (!%p217_p9)  ;;  %s1166_s11 = scalar_lea.vmem (!%p217_p9), %s1165_s10, 1024 }
  0x15   : > { %s1471_s15 = smov (!%p247_p10, %s854_s15), 7  ;;  %1046 = vmatpush3.bf16.msra.mxu0 %v1043_v7  ;;  %v868_v5 = vld [vmem:[%s1462_s5] ss:$0 sm:$0xff] }
  0x16   : > { %s855_s16 = sshll.u32 %s1471_s15, 3  ;;  %1054 = vmatpush3.bf16.msra.mxu1 %v1337_v11  ;;  %985 = vmatprep.subr.mxu0 %v460_v34 }
  0x17   : > { %s250_s19 = scalar_lea.vmem %s1457_s0, %s855_s16  ;;  %1056 = vmatprep.subr.bf16.mxu1 %v1055_v14 }
  0x18   : > { %v253_v15 = vld [vmem:[%s250_s19] sm:$0xff]  ;;  %v254_v18 = vld [vmem:[%s250_s19 + $0x8] sm:$0xff]  ;;  %v255_v19 = vld [vmem:[%s250_s19 + $0x10] sm:$0xff] }
  0x19   : > { %941 = vmatprep.mubr.msk.f32.mxu0 %vm261_vm0, %v253_v15  ;;  %v256_v23 = vld [vmem:[%s250_s19 + $0x18] sm:$0xff]  ;;  %s787_s19 = sshll.u32 %s245_s18, 4  ;;  %s1409_s19 = int_to_ptr.vmem [resolvable:$true] %s787_s19 }
  0x1a   : > { %942 = vmatmul.mubr.msk.f32.vlgmr.msra.gmra.mrb[0].mxu0 %vm261_vm0, %v254_v18  ;;  %1058 = vmatpush3.bf16.msra.mxu1 %v1055_v14  ;;  %s1160_s15 = scalar_lea.vmem %s1409_s19, 512  ;;  %p1167_p0 = scmp.lt.s32.totalorder %s1409_s19, %s1165_s10 }
  0x1b   : > { %944 = vmatprep.mubr.msk.f32.mxu0 %vm261_vm0, %v255_v19  ;;  %1060 = vmatprep.subr.bf16.mxu1 %v1059_v20  ;;  %p1161_p11 = scmp.ne.s32.totalorder %s1409_s19, %s1160_s15  ;;  %p1168_p1 = scmp.lt.s32.totalorder %s1166_s11, %s1160_s15 }
  0x1c   : > { %986 = vmatpush3.msra.mxu0 %v460_v34 }
  0x1d   : > { %1080 = vmatprep.subr.bf16.mxu0 %v1329_v8  ;;  %p1162_p12 = pnand %p1161_p11, %p1300_p5  ;;  %p1169_p2 = por %p1168_p1, %p1167_p0 }
  0x1e   : > { %945 = vmatmul.mubr.msk.f32.gmra.mrb[2].mxu0 %vm261_vm0, %v256_v23  ;;  %1062 = vmatpush3.bf16.msra.mxu1 %v1059_v20 }
  0x1f   : > { %1064 = vmatprep.subr.bf16.mxu1 %v1063_v24  ;;  %p1163_p13 = pneg %p1162_p12 }
  0x21   : > { %p1170_p3 = pnand %p1169_p2, %p1163_p13 }
  0x22   : > { %1066 = vmatpush3.bf16.msra.mxu1 %v1063_v24 }
  0x23   : > { %1068 = vmatprep.subr.bf16.mxu1 %v1067_v27 }
  0x26   : > { %1070 = vmatpush3.bf16.msra.mxu1 %v1067_v27 }
  0x27   : > { %1072 = vmatprep.subr.bf16.mxu1 %v1071_v30 }
  0x2a   : > { %1074 = vmatpush3.bf16.msra.mxu1 %v1071_v30 }
  0x2b   : > { %1076 = vmatprep.subr.bf16.mxu1 %v1075_v33 }
  0x2e   : > { %1078 = vmatpush3.bf16.msra.mxu1 %v1075_v33 }
  0x2f   : > { %1031 = vmatprep.subr.mxu1 %v656_v55 }
  0xed   : > { %v943_v35 = vpop.f32.mrb[0].mxu0 }
  0xee   : > { %v340_v36 = vpop.f32.mrb[1].mxu0 }
  0xef   : > { %979 = vmatprep.mubr.f32.mxu1 %v340_v36 }
  0xf0   : > { %980 = vmatmul.mubr.f32.vlgmr.msra.gmra.mrb[0].mxu1 %v943_v35 }
  0xf1   : > { %v946_v37 = vpop.f32.mrb[2].mxu0  ;;  %1032 = vmatpush3.msra.mxu1 %v656_v55 }
  0xf2   : > { %v350_v38 = vpop.f32.mrb[3].mxu0 }
  0xf3   : > { %982 = vmatprep.mubr.f32.mxu1 %v350_v38 }
  0xf4   : > { %983 = vmatmul.mubr.f32.gmra.mrb[2].mxu1 %v946_v37 }
 0x1c3   : > { %v981_v39 = vpop.f32.mrb[0].mxu1 }
 0x1c4   : > { %v441_v40 = vpop.f32.mrb[1].mxu1 }
 0x1c5   : > { %987 = vmatprep.mubr.msk.f32.mxu0 %vm461_vm1, %v441_v40 }
 0x1c6   : > { %988 = vmatmul.mubr.msk.f32.vlgmr.msra.gmra.mrb[4].mxu0 %vm461_vm1, %v981_v39 }
 0x1c7   : > { %v984_v41 = vpop.f32.mrb[2].mxu1  ;;  %1082 = vmatpush3.bf16.msra.mxu0 %v1329_v8 }
 0x1c8   : > { %v451_v42 = vpop.f32.mrb[3].mxu1  ;;  %1084 = vmatprep.subr.bf16.mxu0 %v1337_v11 }
 0x1c9   : > { %990 = vmatprep.mubr.msk.f32.mxu0 %vm461_vm1, %v451_v42 }
 0x1ca   : > { %991 = vmatmul.mubr.msk.f32.gmra.mrb[6].mxu0 %vm461_vm1, %v984_v41 }
 0x1cb   : > { %1086 = vmatpush3.bf16.msra.mxu0 %v1337_v11 }
 0x1cc   : > { %1088 = vmatprep.subr.bf16.mxu0 %v1055_v14 }
 0x1cf   : > { %1090 = vmatpush3.bf16.msra.mxu0 %v1055_v14 }
 0x1d0   : > { %1092 = vmatprep.subr.bf16.mxu0 %v1059_v20 }
 0x1d3   : > { %1094 = vmatpush3.bf16.msra.mxu0 %v1059_v20 }
 0x1d4   : > { %1096 = vmatprep.subr.bf16.mxu0 %v1063_v24 }
 0x1d7   : > { %1098 = vmatpush3.bf16.msra.mxu0 %v1063_v24 }
 0x1d8   : > { %1100 = vmatprep.subr.bf16.mxu0 %v1067_v27 }
 0x1db   : > { %1102 = vmatpush3.bf16.msra.mxu0 %v1067_v27 }
 0x1dc   : > { %1104 = vmatprep.subr.bf16.mxu0 %v1071_v30 }
 0x1df   : > { %1106 = vmatpush3.bf16.msra.mxu0 %v1071_v30 }
 0x1e0   : > { %1108 = vmatprep.subr.bf16.mxu0 %v1075_v33 }
 0x1e3   : > { %1110 = vmatpush3.bf16.msra.mxu0 %v1075_v33 }
 0x299   : > { %v989_v43 = vpop.f32.mrb[4].mxu0 }
 0x29a   : > { %v560_v44 = vsub.f32 %v943_v35, %v989_v43  ;;  %v540_v45 = vpop.f32.mrb[5].mxu0 }
 0x29b   : > { %v559_v46 = vsub.f32 %v340_v36, %v540_v45 }
 0x29c   : > { %v564_v49 = vmul.f32 %v560_v44, %v560_v44 }
 0x29d   : > { %v563_v47 = vmul.f32 %v559_v46, %v559_v46  ;;  %v992_v48 = vpop.f32.mrb[6].mxu0 }
 0x29e   : > { %v562_v50 = vsub.f32 %v946_v37, %v992_v48  ;;  %v550_v51 = vpop.f32.mrb[7].mxu0 }
 0x29f   : > { %v561_v52 = vsub.f32 %v350_v38, %v550_v51  ;;  %1025 = vmatprep.mubr.f32.mxu0 %v563_v47 }
 0x2a0   : > { %1026 = vmatmul.mubr.f32.vlgmr.msra.gmra.mrb[8].mxu0 %v564_v49  ;;  %v566_v54 = vmul.f32 %v562_v50, %v562_v50 }
 0x2a1   : > { %v565_v53 = vmul.f32 %v561_v52, %v561_v52 }
 0x2a3   : > { %1028 = vmatprep.mubr.f32.mxu0 %v565_v53 }
 0x2a4   : > { %1029 = vmatmul.mubr.f32.gmra.mrb[10].mxu0 %v566_v54 }
 0x373   : > { %v1027_v56 = vpop.f32.mrb[8].mxu0 }
 0x374   : > { %v639_v57 = vadd.f32 1e-05, %v1027_v56  ;;  %v633_v58 = vpop.f32.mrb[9].mxu0 }
 0x375   : > { %v634_v59 = vadd.f32 1e-05, %v633_v58 }
 0x377   : > { %1152 = vrsqrt.f32 %v634_v59  ;;  %v1030_v60 = vpop.f32.mrb[10].mxu0 }
 0x378   : > { %1154 = vrsqrt.f32 %v639_v57  ;;  %v649_v61 = vadd.f32 1e-05, %v1030_v60  ;;  %v643_v62 = vpop.f32.mrb[11].mxu0 }
 0x379   : > { %v644_v63 = vadd.f32 1e-05, %v643_v62 }
 0x37b   : > { %1156 = vrsqrt.f32 %v644_v63 }
 0x37c   : > { %1158 = vrsqrt.f32 %v649_v61 }
 0x381   : > { %v1153_v0 = vpop.eup %1152 }
 0x382   : > { %v1155_v1 = vpop.eup %1154  ;;  %1033 = vmatprep.mubr.msk.f32.mxu1 %vm461_vm1, %v1153_v0 }
 0x383   : > { %1034 = vmatmul.mubr.msk.f32.vlgmr.msra.gmra.mrb[4].mxu1 %vm461_vm1, %v1155_v1 }
 0x385   : > { %v1157_v2 = vpop.eup %1156 }
 0x386   : > { %v1159_v3 = vpop.eup %1158  ;;  %1036 = vmatprep.mubr.msk.f32.mxu1 %vm461_vm1, %v1157_v2 }
 0x387   : > { %1037 = vmatmul.mubr.msk.f32.gmra.mrb[6].mxu1 %vm461_vm1, %v1159_v3 }
 0x456   : > { %v1035_v4 = vpop.f32.mrb[4].mxu1 }
 0x457   : > { %v755_v6 = vmul.f32 %v1035_v4, %v560_v44  ;;  %v735_v7 = vpop.f32.mrb[5].mxu1 }
 0x458   : > { %v754_v8 = vmul.f32 %v735_v7, %v559_v46 }
 0x459   : > { %v766_v9 = vadd.f32 %v868_v5, %v755_v6 }
 0x45a   : > { %v765_v10 = vadd.f32 %v868_v5, %v754_v8  ;;  %v1038_v11 = vpop.f32.mrb[6].mxu1 }
 0x45b   : > { %770 = vst [vmem:[%s245_s18 + $0x8] sm:$0xff] %v766_v9  ;;  %v757_v12 = vmul.f32 %v1038_v11, %v562_v50  ;;  %v745_v13 = vpop.f32.mrb[7].mxu1 }
 0x45c   : > { %769 = vst [vmem:[%s245_s18] sm:$0xff] %v765_v10  ;;  %v756_v14 = vmul.f32 %v745_v13, %v561_v52 }
 0x45d   : > { %v768_v15 = vadd.f32 %v868_v5, %v757_v12 }
 0x45e   : > { %v767_v16 = vadd.f32 %v868_v5, %v756_v14 }
 0x45f   : > { %772 = vst [vmem:[%s245_s18 + $0x18] sm:$0xff] %v768_v15 }
 0x460   : > { %771 = vst [vmem:[%s245_s18 + $0x10] sm:$0xff] %v767_v16 }
 0x461   : > { %1173 = shalt.err (!%p1170_p3)
}
 0x462   : > { %s1174_s12 = scalar_lea.hbm %s1414_s29, 512  ;;  %s1178_s16 = scalar_lea.hbm %s1463_s6, 1024 }
 0x463   : > { %p1175_p4 = scmp.ne.s32.totalorder %s1414_s29, %s1174_s12  ;;  %p1179_p9 = scmp.lt.u32.totalorder %s1414_s29, %s1463_s6 }
 0x464   : > { %p1180_p10 = scmp.lt.u32.totalorder %s1178_s16, %s1174_s12  ;;  %p1182_p12 = scmp.lt.u32.totalorder %s1174_s12, %s1414_s29 }
 0x465   : > { %p1176_p7 = pnand %p1175_p4, %p1300_p5 }
 0x466   : > { %p1181_p11 = por %p1180_p10, %p1179_p9 }
 0x467   : > { %p1177_p8 = pneg %p1176_p7 }
 0x468   : > { %p1183_p13 = por %p1182_p12, %p1181_p11 }
 0x46a   : > { %p1184_p0 = pnand %p1183_p13, %p1177_p8 }
 0x46c   : > { %1187 = shalt.err (!%p1184_p0)
}
 0x46d   : > { %s1225_s20 = smov 128   ;;  %s1226_s26 = smov 8  }
 0x46e   : > { %1111 = dma.vmem_to_hbm [thread:$0]  (%p1300_p5), %s1409_s19, 512, %s1414_s29, %s1416_s25, %s1225_s20, %s1225_s20, %s1226_s26  }
 0x46f PF: > { %p1117_p1 = scmp.ge.s32.totalorder %s1222_s24, 2  ;;  %s802_s28 = sand.u32 1, %s1210_s21  }
 0x470   : > { %s803_s15 = scalar_lea.sflag [#allocation3], %s802_s28 }
 0x471   : > { %p1114_p2 = pnand %p1117_p1, %p1304_p6 }
 0x473   : > { %1205 = dma.done.wait (!%p1114_p2), %s803_s15, 512  }
 0x474   : > { %1207 = vsyncadd (!%p1114_p2), %s803_s15, 4294966784  ;;  %p16_p3 = scmp.ge.s32.totalorder %s1287_s27, 4   ;;  %s1466_s21 = smov %s1214_s22 }
 0x475   : > { %s1467_s22 = smov %s1218_s23  ;;  %s1468_s23 = smov %s1298_s30 }
 0x476   : > { %s1469_s24 = smov %s1287_s27  ;;  %18 = sbr.rel (!%p16_p3) target bundleno = 3 (0x3), region = 79 }
 0x47d   :  { %808 = vsyncpa [#allocation3], 1 }
 0x47e   :  { %810 = vsyncpa [#allocation3 + $0x1], 1 }

</bundles_post_ra>
